<compile_context>
chip_gen: v7x
topology: tpu7x:2x2x1
jax: 0.10.0
libtpu: 0.0.40
codegen_flags: <defaults>
</compile_context>

<pallas_src>
import functools

import jax
import jax.numpy as jnp
from jax.experimental import pallas as pl
from jax.experimental.pallas import tpu as pltpu


# ----------------------------------------------------------------------------
# Hardware detection / budgets
# ----------------------------------------------------------------------------
_TM_CAP = 512  # max rows per M tile (multiple of 16)


@functools.lru_cache(maxsize=None)
def _device_kind():
    try:
        return jax.devices()[0].device_kind.lower()
    except Exception:
        return ""


@functools.lru_cache(maxsize=None)
def _is_multi_tensorcore():
    # v7x has 2 TensorCores per chip; prefer >=2 parallel M tiles there.
    k = _device_kind()
    return ("v7" in k) or ("7x" in k)


@functools.lru_cache(maxsize=None)
def _vmem_capacity_bytes():
    try:
        info = pltpu.get_tpu_info()
        for attr in ("vmem_capacity_bytes", "vmem_bytes", "vmem_size_bytes"):
            v = getattr(info, attr, None)
            if v:
                return int(v)
    except Exception:
        pass
    k = _device_kind()
    if "v2" in k or "v3" in k:
        return 16 * 1024 * 1024
    if "v7" in k or "7x" in k:
        return 64 * 1024 * 1024
    if "v4" in k or "v5" in k or "v6" in k:
        return 128 * 1024 * 1024
    return 64 * 1024 * 1024  # conservative default


def _vmem_budget_bytes():
    # planning budget (leaves headroom for compiler temporaries)
    return int(_vmem_capacity_bytes() * 0.70)


def _vmem_limit_bytes():
    # scoped-VMEM limit handed to Mosaic
    return int(_vmem_capacity_bytes() * 0.85)


# ----------------------------------------------------------------------------
# Small helpers
# ----------------------------------------------------------------------------
def _round_up(x, m):
    return (x + m - 1) // m * m


def _tile(dim, base, max_tile):
    """Pick a tile (multiple of `base`, <= max_tile) and padded dim divisible by it."""
    if dim >= max_tile:
        return max_tile, _round_up(dim, max_tile)
    t = _round_up(dim, base)
    return t, t


def _cast(a, dtype):
    return a if a.dtype == jnp.dtype(dtype) else a.astype(dtype)


def _pad2d(a, rows, cols):
    r, c = a.shape
    if r == rows and c == cols:
        return a
    return jnp.pad(a, ((0, rows - r), (0, cols - c)))


def _m_candidates(M, *, single_m_tile, tm_cap, min_tiles=1):
    """(tm, M_pad) candidates: largest tiles / least padding first; tm % 16 == 0."""
    M16 = _round_up(M, 16)
    if single_m_tile:
        return [(M16, M16)] if M16 <= tm_cap else []
    cands, seen = [], set()
    nt = max(min_tiles, -(-M16 // tm_cap))
    for _ in range(64):
        tm = min(_round_up(-(-M // nt), 16), M16, tm_cap)
        if tm not in seen:
            seen.add(tm)
            cands.append((tm, _round_up(M, tm)))
        if tm <= 16:
            break
        nt += 1
    return cands


def _bn_epilogue(out_f32, m_real, eps):
    """Affine-free BatchNorm1d (training mode, biased var) with padded-row masking."""
    rows = jax.lax.broadcasted_iota(jnp.int32, out_f32.shape, 0)
    mask = (rows < m_real).astype(jnp.float32)
    inv_m = 1.0 / float(m_real)
    mean = jnp.sum(out_f32 * mask, axis=0, keepdims=True) * inv_m
    centered = (out_f32 - mean) * mask
    var = jnp.sum(centered * centered, axis=0, keepdims=True) * inv_m
    return (out_f32 - mean) * jax.lax.rsqrt(var + eps)


# ----------------------------------------------------------------------------
# Fused 2-layer MLP: Linear -> ReLU -> Linear [-> BN], one pallas_call
# ----------------------------------------------------------------------------
def _fused_mlp2_resident_kernel(x_ref, w1_ref, w2_ref, o_ref,
                                *, apply_bn, eps, m_real):
    # w1 and w2 are fully resident in VMEM; one grid step = one M tile.
    h = jnp.dot(x_ref[...], w1_ref[...], preferred_element_type=jnp.float32)
    h = jnp.maximum(h, 0.0).astype(w2_ref.dtype)          # ReLU + bf16 for MXU
    out = jnp.dot(h, w2_ref[...], preferred_element_type=jnp.float32)
    if apply_bn:
        out = _bn_epilogue(out, m_real, eps)
    o_ref[...] = out.astype(o_ref.dtype)


def _fused_mlp2_stream_kernel(x_ref, w1_ref, w2_ref, o_ref, h_acc,
                              *, apply_bn, eps, m_real):
    k = pl.program_id(1)
    partial_h = jnp.dot(x_ref[...], w1_ref[...],
                        preferred_element_type=jnp.float32)

    @pl.when(k == 0)
    def _():
        h_acc[...] = partial_h            # assign (no zero-fill + RMW)

    @pl.when(k > 0)
    def _():
        h_acc[...] += partial_h

    @pl.when(k == pl.num_programs(1) - 1)
    def _():
        h = jnp.maximum(h_acc[...], 0.0).astype(w2_ref.dtype)
        out = jnp.dot(h, w2_ref[...], preferred_element_type=jnp.float32)
        if apply_bn:
            out = _bn_epilogue(out, m_real, eps)
        o_ref[...] = out.astype(o_ref.dtype)


def _plan_fused_mlp2(M, K, H, N, compute_dtype, *, single_m_tile,
                     force_stream_k=False):
    isz = jnp.dtype(compute_dtype).itemsize
    budget = _vmem_budget_bytes()
    H_pad = _round_up(H, 128)
    N_pad = _round_up(N, 128)

    # --- preferred: w1 fully resident, no reduction grid axis ---------------
    if not force_stream_k:
        K_pad = _round_up(K, 128)
        min_tiles = 2 if (_is_multi_tensorcore() and not single_m_tile) else 1
        for tm, M_pad in _m_candidates(M, single_m_tile=single_m_tile,
                                       tm_cap=_TM_CAP, min_tiles=min_tiles):
            vmem = (2 * tm * K_pad * isz          # x tiles (double-buffered)
                    + 2 * K_pad * H_pad * isz     # w1 (constant block; 2x to be safe)
                    + 2 * H_pad * N_pad * isz     # w2
                    + 2 * tm * N_pad * 4          # f32 output tiles
                    + tm * H_pad * (4 + isz))     # hidden f32 + bf16 temporaries
            if vmem <= budget:
                return dict(resident=True, tm=tm, M_pad=M_pad, tk=None,
                            K_pad=K_pad, H_pad=H_pad, N_pad=N_pad)

    # --- fallback: stream w1 along K, f32 VMEM hidden accumulator -----------
    for tm, M_pad in _m_candidates(M, single_m_tile=single_m_tile,
                                   tm_cap=_TM_CAP):
        for tk_cap in (512, 256, 128):
            tk, K_pad = _tile(K, 128, tk_cap)
            vmem = (2 * tm * tk * isz
                    + 2 * tk * H_pad * isz
                    + 2 * H_pad * N_pad * isz
                    + 2 * tm * N_pad * 4
                    + tm * H_pad * (4 + isz))
            if vmem <= budget:
                return dict(resident=False, tm=tm, M_pad=M_pad, tk=tk,
                            K_pad=K_pad, H_pad=H_pad, N_pad=N_pad)
    return None


def fused_mlp2(x, w1, w2, *, apply_bn, eps=1e-5,
               compute_dtype=jnp.bfloat16, out_dtype=jnp.float32,
               force_stream_k=False):
    M, K = x.shape
    K2, H = w1.shape
    H2, N = w2.shape
    assert K == K2 and H == H2

    plan = _plan_fused_mlp2(M, K, H, N, compute_dtype,
                            single_m_tile=apply_bn,
                            force_stream_k=force_stream_k)
    if plan is None:
        return None  # caller falls back to the per-layer path

    tm, M_pad = plan["tm"], plan["M_pad"]
    K_pad, H_pad, N_pad = plan["K_pad"], plan["H_pad"], plan["N_pad"]
    if apply_bn:
        assert M_pad == tm, "fused BN needs the full batch in one M tile"

    isz = jnp.dtype(compute_dtype).itemsize
    osz = jnp.dtype(out_dtype).itemsize

    xp = _pad2d(_cast(x, compute_dtype), M_pad, K_pad)
    w1p = _pad2d(_cast(w1, compute_dtype), K_pad, H_pad)
    w2p = _pad2d(_cast(w2, compute_dtype), H_pad, N_pad)

    n_m = M_pad // tm
    flops = 2 * M_pad * K_pad * H_pad + 2 * M_pad * H_pad * N_pad

    if plan["resident"]:
        cost = pl.CostEstimate(
            flops=flops, transcendentals=0,
            bytes_accessed=(M_pad * K_pad * isz + K_pad * H_pad * isz
                            + H_pad * N_pad * isz + M_pad * N_pad * osz))
        out = pl.pallas_call(
            functools.partial(_fused_mlp2_resident_kernel,
                              apply_bn=apply_bn, eps=eps, m_real=M),
            out_shape=jax.ShapeDtypeStruct((M_pad, N_pad), out_dtype),
            grid=(n_m,),
            in_specs=[
                pl.BlockSpec((tm, K_pad), lambda m: (m, 0)),
                pl.BlockSpec((K_pad, H_pad), lambda m: (0, 0)),
                pl.BlockSpec((H_pad, N_pad), lambda m: (0, 0)),
            ],
            out_specs=pl.BlockSpec((tm, N_pad), lambda m: (m, 0)),
            compiler_params=pltpu.CompilerParams(
                dimension_semantics=("parallel",),
                vmem_limit_bytes=_vmem_limit_bytes()),
            cost_estimate=cost,
        )(xp, w1p, w2p)
    else:
        tk = plan["tk"]
        cost = pl.CostEstimate(
            flops=flops, transcendentals=0,
            bytes_accessed=(M_pad * K_pad * isz
                            + n_m * K_pad * H_pad * isz   # w1 re-streamed per M tile
                            + H_pad * N_pad * isz
                            + M_pad * N_pad * osz))
        out = pl.pallas_call(
            functools.partial(_fused_mlp2_stream_kernel,
                              apply_bn=apply_bn, eps=eps, m_real=M),
            out_shape=jax.ShapeDtypeStruct((M_pad, N_pad), out_dtype),
            grid=(n_m, K_pad // tk),
            in_specs=[
                pl.BlockSpec((tm, tk), lambda m, k: (m, k)),
                pl.BlockSpec((tk, H_pad), lambda m, k: (k, 0)),
                pl.BlockSpec((H_pad, N_pad), lambda m, k: (0, 0)),
            ],
            out_specs=pl.BlockSpec((tm, N_pad), lambda m, k: (m, 0)),
            scratch_shapes=[pltpu.VMEM((tm, H_pad), jnp.float32)],
            compiler_params=pltpu.CompilerParams(
                dimension_semantics=("parallel", "arbitrary"),
                vmem_limit_bytes=_vmem_limit_bytes()),
            cost_estimate=cost,
        )(xp, w1p, w2p)
    return out[:M, :N]


# ----------------------------------------------------------------------------
# General tiled Linear (+ fused ReLU / BN epilogue) — fallback for L != 2
# ----------------------------------------------------------------------------
def _linear_kernel(x_ref, w_ref, o_ref, acc_ref,
                   *, apply_relu, apply_bn, eps, m_real):
    k = pl.program_id(2)
    partial = jnp.dot(x_ref[...], w_ref[...], preferred_element_type=jnp.float32)

    @pl.when(k == 0)
    def _():
        acc_ref[...] = partial            # assign (no zero-fill + RMW)

    @pl.when(k > 0)
    def _():
        acc_ref[...] += partial

    @pl.when(k == pl.num_programs(2) - 1)
    def _():
        out = acc_ref[...]
        if apply_relu:
            out = jnp.maximum(out, 0.0)
        if apply_bn:
            out = _bn_epilogue(out, m_real, eps)
        o_ref[...] = out.astype(o_ref.dtype)


def pallas_linear(x, w, *, apply_relu, apply_bn=False, eps=1e-5,
                  compute_dtype=jnp.bfloat16, out_dtype=None):
    M, K = x.shape
    K2, N = w.shape
    assert K == K2
    out_dtype = out_dtype or x.dtype
    isz = jnp.dtype(compute_dtype).itemsize
    osz = jnp.dtype(out_dtype).itemsize
    budget = _vmem_budget_bytes()

    tk, K_pad = _tile(K, 128, 512)
    tn, N_pad = _tile(N, 128, 512)

    cands = _m_candidates(M, single_m_tile=apply_bn, tm_cap=_TM_CAP)
    if not cands:
        raise ValueError("fused BN needs the whole batch in one <=512-row M tile")
    tm, M_pad = cands[-1]
    for c_tm, c_M_pad in cands:
        vmem = (2 * c_tm * tk * isz + 2 * tk * tn * isz
                + 2 * c_tm * tn * osz + c_tm * tn * 4)
        if vmem <= budget:
            tm, M_pad = c_tm, c_M_pad
            break

    xp = _pad2d(_cast(x, compute_dtype), M_pad, K_pad)
    wp = _pad2d(_cast(w, compute_dtype), K_pad, N_pad)

    n_m = M_pad // tm
    cost = pl.CostEstimate(
        flops=2 * M_pad * K_pad * N_pad,
        transcendentals=0,
        bytes_accessed=(M_pad * K_pad * isz
                        + n_m * K_pad * N_pad * isz   # w re-streamed per M tile
                        + M_pad * N_pad * osz))

    out = pl.pallas_call(
        functools.partial(_linear_kernel, apply_relu=apply_relu,
                          apply_bn=apply_bn, eps=eps, m_real=M),
        out_shape=jax.ShapeDtypeStruct((M_pad, N_pad), out_dtype),
        grid=(M_pad // tm, N_pad // tn, K_pad // tk),
        in_specs=[
            pl.BlockSpec((tm, tk), lambda m, n, k: (m, k)),
            pl.BlockSpec((tk, tn), lambda m, n, k: (k, n)),
        ],
        out_specs=pl.BlockSpec((tm, tn), lambda m, n, k: (m, n)),
        scratch_shapes=[pltpu.VMEM((tm, tn), jnp.float32)],
        compiler_params=pltpu.CompilerParams(
            dimension_semantics=("parallel", "parallel", "arbitrary"),
            vmem_limit_bytes=_vmem_limit_bytes()),
        cost_estimate=cost,
    )(xp, wp)
    return out[:M, :N]


# ----------------------------------------------------------------------------
# Standalone BatchNorm1d(affine=False) — only used when the batch does not fit
# one M tile of the last linear.
# ----------------------------------------------------------------------------
def _bn_kernel(x_ref, o_ref, *, eps, m_real):
    o_ref[...] = _bn_epilogue(x_ref[...].astype(jnp.float32), m_real, eps
                              ).astype(o_ref.dtype)


def pallas_batchnorm(x, *, eps=1e-5):
    M, N = x.shape
    M_pad = _round_up(M, 8)
    budget = _vmem_budget_bytes()
    # Cap the (M_pad x tn) f32 block so in+out double-buffered blocks fit VMEM.
    tn_cap = 512
    while tn_cap > 128 and 4 * M_pad * tn_cap * 4 > budget:
        tn_cap //= 2
    tn, N_pad = _tile(N, 128, tn_cap)
    xp = _pad2d(x, M_pad, N_pad)
    out = pl.pallas_call(
        functools.partial(_bn_kernel, eps=eps, m_real=M),
        out_shape=jax.ShapeDtypeStruct((M_pad, N_pad), x.dtype),
        grid=(N_pad // tn,),
        in_specs=[pl.BlockSpec((M_pad, tn), lambda n: (0, n))],
        out_specs=pl.BlockSpec((M_pad, tn), lambda n: (0, n)),
        compiler_params=pltpu.CompilerParams(
            dimension_semantics=("parallel",),
            vmem_limit_bytes=_vmem_limit_bytes()),
    )(xp)
    return out[:M, :N]


# ----------------------------------------------------------------------------
# Module: MLP_wo_batch
# ----------------------------------------------------------------------------
def init_mlp_params(key, num_layers, dim, projection_size, hidden_size=4096):
    """Linear(bias=False) weights, stored transposed as (in, out) so y = x @ W."""
    weights = []
    for l in range(num_layers):
        d1 = dim if l == 0 else hidden_size
        d2 = projection_size if l == num_layers - 1 else hidden_size
        key, sub = jax.random.split(key)
        bound = 1.0 / (d1 ** 0.5)
        w = jax.random.uniform(sub, (d1, d2), jnp.float32, -bound, bound)
        weights.append(w)
    return weights


def prepare_mlp_weights(weights, compute_dtype=jnp.bfloat16):
    """Hoist the f32->bf16 weight cast out of the hot path (call once)."""
    return [_cast(w, compute_dtype) for w in weights]


def mlp_wo_batch_forward(x, weights, *, last_bn=False, eps=1e-5,
                         compute_dtype=jnp.bfloat16, force_stream_k=False):
    """[Linear -> ReLU] * (L-1) -> Linear [-> BatchNorm1d(affine=False)]."""
    M = x.shape[0]
    L = len(weights)
    batch_fits_one_tile = _round_up(M, 16) <= _TM_CAP

    if L == 2:
        fuse_bn = last_bn and batch_fits_one_tile
        out = fused_mlp2(x, weights[0], weights[1], apply_bn=fuse_bn, eps=eps,
                         compute_dtype=compute_dtype, out_dtype=jnp.float32,
                         force_stream_k=force_stream_k)
        if out is not None:
            if last_bn and not fuse_bn:
                out = pallas_batchnorm(out, eps=eps)
            return out
        # pathological sizes: fall through to the per-layer path

    h = x
    for l, w in enumerate(weights):
        is_last = (l == L - 1)
        fuse_bn = last_bn and is_last and batch_fits_one_tile
        h = pallas_linear(
            h, w,
            apply_relu=not is_last,
            apply_bn=fuse_bn,
            eps=eps,
            compute_dtype=compute_dtype,
            out_dtype=jnp.float32 if is_last else compute_dtype,
        )
    if last_bn and not batch_fits_one_tile:
        h = pallas_batchnorm(h, eps=eps)
    return h


# ----------------------------------------------------------------------------
# Pure-JAX reference (matching bf16-compute / f32-accumulate semantics)
# ----------------------------------------------------------------------------
def ref_forward(x, weights, *, last_bn, eps=1e-5, compute_dtype=jnp.bfloat16):
    h = x
    L = len(weights)
    for l, w in enumerate(weights):
        h = jnp.dot(h.astype(compute_dtype), w.astype(compute_dtype),
                    preferred_element_type=jnp.float32)
        if l < L - 1:
            h = jnp.maximum(h, 0.0)
    out = h
    if last_bn:
        mean = jnp.mean(out, axis=0, keepdims=True)
        var = jnp.mean((out - mean) ** 2, axis=0, keepdims=True)
        out = (out - mean) * jax.lax.rsqrt(var + eps)
    return out


# ----------------------------------------------------------------------------
# Main
# ----------------------------------------------------------------------------
if __name__ == "__main__":
    key = jax.random.PRNGKey(0)

    def check(num_layers, batch, dim, hidden, proj, last_bn, key,
              force_stream_k=False, prepared=False):
        key, xk, wk = jax.random.split(key, 3)
        x = jax.random.normal(xk, (batch, dim), jnp.float32)
        weights = init_mlp_params(wk, num_layers, dim, proj, hidden)
        run_weights = prepare_mlp_weights(weights) if prepared else weights
        out = jax.block_until_ready(
            mlp_wo_batch_forward(x, run_weights, last_bn=last_bn,
                                 force_stream_k=force_stream_k))
        ref = ref_forward(x, weights, last_bn=last_bn)
        assert out.shape == (batch, proj), out.shape
        err = float(jnp.max(jnp.abs(out - ref)))
        assert jnp.allclose(out, ref, atol=2e-2, rtol=2e-2), err
        return key

    # 2-layer MLP -> fused single-kernel path, w1 resident, no BN
    key = check(num_layers=2, batch=8, dim=32, hidden=64, proj=16,
                last_bn=False, key=key)
    # 2-layer MLP with last_bn=True, pre-cast weights -> BN fused in epilogue
    key = check(num_layers=2, batch=8, dim=32, hidden=64, proj=16,
                last_bn=True, key=key, prepared=True)
    # 2-layer MLP with a multi-step K reduction (forced K-streaming layout)
    key = check(num_layers=2, batch=8, dim=640, hidden=64, proj=16,
                last_bn=True, key=key, force_stream_k=True)
    # 3-layer MLP -> general per-layer tiled path, BN fused into last linear
    key = check(num_layers=3, batch=8, dim=24, hidden=48, proj=8,
                last_bn=True, key=key)
    # Batch too large for one M tile -> multiple parallel M tiles + standalone BN
    key = check(num_layers=2, batch=528, dim=32, hidden=64, proj=16,
                last_bn=True, key=key)

    print("KERNEL_OK")
</pallas_src>

<mosaic_0001>
module attributes {stable_mosaic.version = 11 : i64} {
  func.func @_fused_mlp2_resident_kernel(%arg0: i32, %arg1: memref<16x128xbf16, #tpu.memory_space<vmem>>, %arg2: memref<128x128xbf16, #tpu.memory_space<vmem>>, %arg3: memref<128x128xbf16, #tpu.memory_space<vmem>>, %arg4: memref<16x128xf32, #tpu.memory_space<vmem>>) attributes {dimension_semantics = [#tpu.dimension_semantics<parallel>], iteration_bounds = array<i64: 1>, scalar_prefetch = 0 : i64, scratch_operands = 0 : i64, tpu.core_type = #tpu.core_type<tc>, window_params = [{transform_indices = @transform_0, window_bounds = array<i64: 16, 128>}, {pipeline_mode = #tpu.pipeline_mode<synchronous>, transform_indices = @transform_1, window_bounds = array<i64: 128, 128>}, {pipeline_mode = #tpu.pipeline_mode<synchronous>, transform_indices = @transform_2, window_bounds = array<i64: 128, 128>}, {transform_indices = @transform_3, window_bounds = array<i64: 16, 128>}]} {
    %c0 = arith.constant 0 : index
    %c0_0 = arith.constant 0 : index
    %0 = vector.load %arg1[%c0, %c0_0] : memref<16x128xbf16, #tpu.memory_space<vmem>>, vector<16x128xbf16>
    %c0_1 = arith.constant 0 : index
    %c0_2 = arith.constant 0 : index
    %1 = vector.load %arg2[%c0_1, %c0_2] : memref<128x128xbf16, #tpu.memory_space<vmem>>, vector<128x128xbf16>
    %cst = arith.constant dense<0.000000e+00> : vector<16x128xf32>
    %2 = tpu.matmul %0, %1, %cst {dimension_numbers = #tpu.dot_dimension_numbers<[1], [0], [0], [1], [0, 0, 1, 1], [], []>} : vector<16x128xbf16>, vector<128x128xbf16>, vector<16x128xf32> -> vector<16x128xf32>
    %cst_3 = arith.constant 0.000000e+00 : f32
    %3 = vector.broadcast %cst_3 : f32 to vector<16x128xf32>
    %4 = arith.maximumf %2, %3 : vector<16x128xf32>
    %5 = arith.truncf %4 : vector<16x128xf32> to vector<16x128xbf16>
    %c0_4 = arith.constant 0 : index
    %c0_5 = arith.constant 0 : index
    %6 = vector.load %arg3[%c0_4, %c0_5] : memref<128x128xbf16, #tpu.memory_space<vmem>>, vector<128x128xbf16>
    %cst_6 = arith.constant dense<0.000000e+00> : vector<16x128xf32>
    %7 = tpu.matmul %5, %6, %cst_6 {dimension_numbers = #tpu.dot_dimension_numbers<[1], [0], [0], [1], [0, 0, 1, 1], [], []>} : vector<16x128xbf16>, vector<128x128xbf16>, vector<16x128xf32> -> vector<16x128xf32>
    %c0_7 = arith.constant 0 : index
    %c0_8 = arith.constant 0 : index
    %8 = vector.load %arg4[%c0_7, %c0_8] : memref<16x128xf32, #tpu.memory_space<vmem>>, vector<16x128xf32>
    tpu.vector_store %arg4[%c0_7, %c0_8], %7 {strides = array<i32>} : memref<16x128xf32, #tpu.memory_space<vmem>>, vector<16x128xf32>,
    return
  }
  func.func @transform_0(%arg0: i32) -> (i32, i32) {
    %c0_i32 = arith.constant 0 : i32
    %c0_i32_0 = arith.constant 0 : i32
    return %arg0, %c0_i32 : i32, i32
  }
  func.func @transform_1(%arg0: i32) -> (i32, i32) {
    %c0_i32 = arith.constant 0 : i32
    %c0_i32_0 = arith.constant 0 : i32
    %c0_i32_1 = arith.constant 0 : i32
    return %c0_i32, %c0_i32_0 : i32, i32
  }
  func.func @transform_2(%arg0: i32) -> (i32, i32) {
    %c0_i32 = arith.constant 0 : i32
    %c0_i32_0 = arith.constant 0 : i32
    %c0_i32_1 = arith.constant 0 : i32
    return %c0_i32, %c0_i32_0 : i32, i32
  }
  func.func @transform_3(%arg0: i32) -> (i32, i32) {
    %c0_i32 = arith.constant 0 : i32
    %c0_i32_0 = arith.constant 0 : i32
    return %arg0, %c0_i32 : i32, i32
  }
}

</mosaic_0001>

<bundles_post_ra>
// kernel: tpu_custom_call.1
= control target key start
LH: loop header
LB: loop body
LE: loop exit
PB: predicated region body
PF: predicated region fallthrough
CT: control target
= control target key end

     0   :  { %8 = vsyncpa [#allocation3], 0  ;;  %s588_s0 = inlined_call_operand.hbm [shape: bf16[16,128], index: 0, kind: input, shape index: {}]   ;;  %s589_s1 = inlined_call_operand.hbm [shape: bf16[128,128], index: 1, kind: input, shape index: {}]   ;;  %s590_s2 = inlined_call_operand.hbm [shape: bf16[128,128], index: 2, kind: input, shape index: {}]   ;;  %s591_s3 = inlined_call_operand.hbm [shape: f32[16,128], index: 3, kind: output, shape index: {}]  }
   0x1   :  { %9 = vsyncpa [#allocation6], 0 }
   0x2   :  { %10 = vsyncpa [#allocation4], 0  ;;  %s494_s12 = smov [#allocation5]   ;;  %s495_s14 = smov [#allocation2]  }
   0x3   :  { %s28_s13 = sshll.u32 %s494_s12, 4  ;;  %s16_s15 = sshll.u32 %s495_s14, 4  ;;  %s29_s13 = int_to_ptr.vmem [resolvable:$true] %s28_s13  ;;  %s524_s15 = int_to_ptr.vmem [resolvable:$true] %s16_s15 }
   0x4   :  { %s400_s18 = scalar_lea.hbm %s589_s1, 1024 }
   0x5   :  { %p401_p0 = scmp.ne.s32.totalorder %s589_s1, %s400_s18  ;;  %p404_p1 = scmp.lt.u32.totalorder %s400_s18, %s589_s1 }
   0x7   :  { %p406_p2 = pnand %p404_p1, %p401_p0 }
   0x9   :  { %409 = shalt.err (!%p406_p2)
}
   0xa   :  { %s410_s23 = scalar_lea.vmem %s29_s13, 1024  ;;  %p415_p4 = scmp.lt.s32.totalorder %s29_s13, %s29_s13 }
   0xb   :  { %p411_p3 = scmp.ne.s32.totalorder %s29_s13, %s410_s23  ;;  %p416_p5 = scmp.lt.s32.totalorder %s410_s23, %s410_s23 }
   0xd   :  { %p417_p6 = por %p416_p5, %p415_p4 }
   0xf   :  { %p418_p7 = pnand %p417_p6, %p411_p3 }
  0x11   :  { %421 = shalt.err (!%p418_p7)
}
  0x12   :  { %s496_s24 = smov 64   ;;  %s497_s25 = smov 4  }
  0x13   :  { %34 = dma.hbm_to_vmem [thread:$0]  %s589_s1, 1024, %s29_s13, [#allocation6], %s496_s24, %s496_s24, %s497_s25  }
  0x14   :  { %s422_s30 = scalar_lea.hbm %s588_s0, 128 }
  0x15   :  { %p423_p8 = scmp.ne.s32.totalorder %s588_s0, %s422_s30  ;;  %p426_p9 = scmp.lt.u32.totalorder %s422_s30, %s588_s0 }
  0x17   :  { %p428_p10 = pnand %p426_p9, %p423_p8 }
  0x19   :  { %431 = shalt.err (!%p428_p10)
}
  0x1a   :  { %s432_s8 = scalar_lea.vmem %s524_s15, 128  ;;  %p437_p12 = scmp.lt.s32.totalorder %s524_s15, %s524_s15 }
  0x1b   :  { %p433_p11 = scmp.ne.s32.totalorder %s524_s15, %s432_s8  ;;  %p438_p13 = scmp.lt.s32.totalorder %s432_s8, %s432_s8 }
  0x1d   :  { %p439_p0 = por %p438_p13, %p437_p12 }
  0x1f   :  { %p440_p1 = pnand %p439_p0, %p433_p11 }
  0x21   :  { %443 = shalt.err (!%p440_p1)
}
  0x22   :  { %22 = dma.hbm_to_vmem [thread:$0]  %s588_s0, 128, %s524_s15, [#allocation3], %s496_s24, %s496_s24, %s497_s25  }
  0x23   :  { %s498_s10 = smov [#allocation7]   ;;  %s444_s14 = scalar_lea.hbm %s590_s2, 1024 }
  0x24   :  { %s40_s11 = sshll.u32 %s498_s10, 4  ;;  %p445_p2 = scmp.ne.s32.totalorder %s590_s2, %s444_s14  ;;  %s41_s11 = int_to_ptr.vmem [resolvable:$true] %s40_s11 }
  0x25   :  { %p448_p3 = scmp.lt.u32.totalorder %s444_s14, %s590_s2 }
  0x27   :  { %p450_p4 = pnand %p448_p3, %p445_p2 }
  0x29   :  { %453 = shalt.err (!%p450_p4)
}
  0x2a   :  { %s454_s20 = scalar_lea.vmem %s41_s11, 1024  ;;  %p459_p6 = scmp.lt.s32.totalorder %s41_s11, %s41_s11 }
  0x2b   :  { %p455_p5 = scmp.ne.s32.totalorder %s41_s11, %s454_s20  ;;  %p460_p7 = scmp.lt.s32.totalorder %s454_s20, %s454_s20 }
  0x2d   :  { %p461_p8 = por %p460_p7, %p459_p6 }
  0x2f   :  { %p462_p9 = pnand %p461_p8, %p455_p5 }
  0x31   :  { %465 = shalt.err (!%p462_p9)
}
  0x32   :  { %46 = dma.hbm_to_vmem [thread:$0]  %s590_s2, 1024, %s41_s11, [#allocation6], %s496_s24, %s496_s24, %s497_s25  }
  0x33   :  { %488 = dma.done.wait [#allocation3], 128  }
  0x34   :  { %489 = vsyncadd [#allocation3], 4294967168 }
  0x35   :  { %490 = dma.done.wait [#allocation6], 2048  }
  0x36   :  { %491 = vsyncadd [#allocation6], 4294965248  ;;  %v499_v0 = vmov 0.0   ;;  %vm500_vm0 = vmmov 0   ;;  %v383_v1 = vld [vmem:[#allocation5] sm:$0xff]   ;;  %v384_v2 = vld [vmem:[#allocation5 + $0x8] sm:$0xff]  }
  0x37   :  { %333 = vmatprep.subr.bf16.mxu0 %v499_v0  ;;  %349 = vmatprep.mubr.msk.bf16.mxu0 %vm500_vm0, %v499_v0  ;;  %v385_v3 = vld [vmem:[#allocation5 + $0x10] sm:$0xff]   ;;  %v392_v4 = vld [vmem:[#allocation7] sm:$0xff]   ;;  %v386_v5 = vld [vmem:[#allocation5 + $0x18] sm:$0xff]   ;;  %s501_s2 = smov [#allocation8]  }
  0x38   :  { %353 = vmatprep.subr.bf16.mxu1 %v499_v0  ;;  %369 = vmatprep.mubr.msk.bf16.mxu1 %vm500_vm0, %v499_v0  ;;  %v393_v6 = vld [vmem:[#allocation7 + $0x8] sm:$0xff]   ;;  %v387_v7 = vld [vmem:[#allocation5 + $0x20] sm:$0xff]   ;;  %v394_v8 = vld [vmem:[#allocation7 + $0x10] sm:$0xff]   ;;  %s285_s21 = sshll.u32 %s501_s2, 4  ;;  %s286_s21 = int_to_ptr.vmem [resolvable:$true] %s285_s21 }
  0x39   :  { %334 = vmatpush3.bf16.msra.mxu0 %v383_v1  ;;  %354 = vmatpush3.bf16.msra.mxu1 %v392_v4  ;;  %v388_v9 = vld [vmem:[#allocation5 + $0x28] sm:$0xff]   ;;  %v395_v10 = vld [vmem:[#allocation7 + $0x18] sm:$0xff]   ;;  %v389_v11 = vld [vmem:[#allocation5 + $0x30] sm:$0xff]   ;;  %s466_s22 = scalar_lea.vmem %s286_s21, 256  ;;  %p471_p11 = scmp.lt.s32.totalorder %s286_s21, %s286_s21 }
  0x3a   :  { %335 = vmatprep.subr.bf16.mxu0 %v499_v0  ;;  %355 = vmatprep.subr.bf16.mxu1 %v499_v0  ;;  %v396_v12 = vld [vmem:[#allocation7 + $0x20] sm:$0xff]   ;;  %v390_v13 = vld [vmem:[#allocation5 + $0x38] sm:$0xff]   ;;  %v397_v14 = vld [vmem:[#allocation7 + $0x28] sm:$0xff]   ;;  %p467_p10 = scmp.ne.s32.totalorder %s286_s21, %s466_s22  ;;  %p472_p12 = scmp.lt.s32.totalorder %s466_s22, %s466_s22 }
  0x3b   :  { %v391_v15 = vld [vmem:[#allocation2] sm:$0xff]   ;;  %v398_v16 = vld [vmem:[#allocation7 + $0x30] sm:$0xff]  }
  0x3c   :  { %v399_v17 = vld [vmem:[#allocation7 + $0x38] sm:$0xff]   ;;  %p473_p13 = por %p472_p12, %p471_p11 }
  0x3d   :  { %336 = vmatpush3.bf16.msra.mxu0 %v384_v2  ;;  %356 = vmatpush3.bf16.msra.mxu1 %v393_v6 }
  0x3e   :  { %337 = vmatprep.subr.bf16.mxu0 %v499_v0  ;;  %357 = vmatprep.subr.bf16.mxu1 %v499_v0  ;;  %p474_p0 = pnand %p473_p13, %p467_p10 }
  0x41   :  { %338 = vmatpush3.bf16.msra.mxu0 %v385_v3  ;;  %358 = vmatpush3.bf16.msra.mxu1 %v394_v8 }
  0x42   :  { %339 = vmatprep.subr.bf16.mxu0 %v499_v0  ;;  %359 = vmatprep.subr.bf16.mxu1 %v499_v0 }
  0x45   :  { %340 = vmatpush3.bf16.msra.mxu0 %v386_v5  ;;  %360 = vmatpush3.bf16.msra.mxu1 %v395_v10 }
  0x46   :  { %341 = vmatprep.subr.bf16.mxu0 %v499_v0  ;;  %361 = vmatprep.subr.bf16.mxu1 %v499_v0 }
  0x49   :  { %342 = vmatpush3.bf16.msra.mxu0 %v387_v7  ;;  %362 = vmatpush3.bf16.msra.mxu1 %v396_v12 }
  0x4a   :  { %343 = vmatprep.subr.bf16.mxu0 %v499_v0  ;;  %363 = vmatprep.subr.bf16.mxu1 %v499_v0 }
  0x4d   :  { %344 = vmatpush3.bf16.msra.mxu0 %v388_v9  ;;  %364 = vmatpush3.bf16.msra.mxu1 %v397_v14 }
  0x4e   :  { %345 = vmatprep.subr.bf16.mxu0 %v499_v0  ;;  %365 = vmatprep.subr.bf16.mxu1 %v499_v0 }
  0x51   :  { %346 = vmatpush3.bf16.msra.mxu0 %v389_v11  ;;  %366 = vmatpush3.bf16.msra.mxu1 %v398_v16 }
  0x52   :  { %347 = vmatprep.subr.bf16.mxu0 %v499_v0  ;;  %367 = vmatprep.subr.bf16.mxu1 %v499_v0 }
  0x55   :  { %348 = vmatpush3.bf16.msra.mxu0 %v390_v13  ;;  %368 = vmatpush3.bf16.msra.mxu1 %v399_v17 }
  0x58   :  { %350 = vmatmul.mubr.bf16.vlgmr.msra.gmra.mrb[0].mxu0 %v391_v15 }
 0x12b   :  { %v163_v18 = vpop.f32.mrb[0].mxu0 }
 0x12c   :  { %v351_v19 = vpop.f32.mrb[1].mxu0  ;;  %v170_v21 = vmax.f32 %v163_v18, 0.0 }
 0x12d   :  { %v166_v20 = vpop.f32.mrb[2].mxu0 }
 0x12e   :  { %v171_v22 = vmax.f32 %v166_v20, 0.0  ;;  %v352_v23 = vpop.f32.mrb[3].mxu0 }
 0x130   :  { %v172_v24 = vpack.c.bf16 %v171_v22, %v170_v21 }
 0x132   :  { %370 = vmatmul.mubr.bf16.vlgmr.msra.gmra.mrb[0].mxu1 %v172_v24 }
 0x205   :  { %v271_v25 = vpop.f32.mrb[0].mxu1 }
 0x206   :  { %278 = vst [vmem:[#allocation8] sm:$0xff] %v271_v25  ;;  %v371_v26 = vpop.f32.mrb[1].mxu1 }
 0x207   :  { %v274_v27 = vpop.f32.mrb[2].mxu1 }
 0x208   :  { %279 = vst [vmem:[#allocation8 + $0x8] sm:$0xff] %v274_v27  ;;  %v372_v28 = vpop.f32.mrb[3].mxu1 }
 0x209   :  { %477 = shalt.err (!%p474_p0)
}
 0x20a   :  { %s478_s25 = scalar_lea.hbm %s591_s3, 256 }
 0x20b   :  { %p479_p1 = scmp.ne.s32.totalorder %s591_s3, %s478_s25  ;;  %p482_p2 = scmp.lt.u32.totalorder %s478_s25, %s591_s3 }
 0x20d   :  { %p484_p3 = pnand %p482_p2, %p479_p1 }
 0x20f   :  { %487 = shalt.err (!%p484_p3)
}
 0x210   :  { %s502_s30 = smov 128   ;;  %s503_s4 = smov 8  }
 0x211   :  { %291 = dma.vmem_to_hbm [thread:$0]  %s286_s21, 256, %s591_s3, [#allocation4], %s502_s30, %s502_s30, %s503_s4  }
 0x212   :  { %492 = dma.done.wait [#allocation4], 256  }
 0x213   :  { %493 = vsyncadd [#allocation4], 4294967040 }
 0x214   :  { %295 = vsyncpa [#allocation3], 1 }
 0x215   :  { %296 = vsyncpa [#allocation6], 1 }
 0x216   :  { %297 = vsyncpa [#allocation4], 1 }

</bundles_post_ra>
